<compile_context>
chip_gen: v5e
topology: v5e:2x2
jax: 0.10.0
libtpu: 0.0.40
codegen_flags: <defaults>
</compile_context>

<pallas_src>
import jax
import jax.numpy as jnp
from jax.experimental import pallas as pl
from jax.experimental.pallas import tpu as pltpu

IMAGE_RGB_MEAN = [0.5, 0.5, 0.5]
IMAGE_RGB_STD = [0.5, 0.5, 0.5]

_LANE = 128  # vreg lane width


def _target_block_bytes():
    """Per-stream block-byte target, tuned per TPU generation.

    v5e (~0.8 TB/s HBM): 2 MiB blocks keep the per-step overhead ~10% and
    2 streams x 2 buffers x 2 MiB leaves plenty of headroom.
    v6e / v7x (1.4 / 3.2 TB/s): 4 MiB blocks keep the per-step overhead ~10%
    while 2 x 2 x 4 MiB = 16 MiB of windows still fits v7x's 64 MiB physical
    VMEM comfortably (do not go bigger on v7x).
    """
    try:
        kind = jax.devices()[0].device_kind.lower()
    except Exception:
        kind = ""
    if "v5" in kind:
        return 2 * 1024 * 1024
    return 4 * 1024 * 1024


def _rgb_plane_kernel(scale_ref, bias_ref, x_ref, o_ref):
    # out = x * scale[c] + bias[c]; scale = 1/std, bias = -mean/std.
    # scale/bias depend only on the channel grid axis -> one SMEM scalar each.
    c = pl.program_id(1)
    x = x_ref[...].astype(jnp.float32)
    o_ref[...] = (x * scale_ref[c] + bias_ref[c]).astype(o_ref.dtype)


def _rgb_row_kernel(x_ref, scale_ref, bias_ref, o_ref):
    # Ragged-lane path: per-row (image, channel) scale/bias broadcast over HW.
    x = x_ref[...].astype(jnp.float32)
    o_ref[...] = (x * scale_ref[...] + bias_ref[...]).astype(o_ref.dtype)


def _normalize_planes(x3, scale_c, bias_c, out_dtype, target_bytes):
    """Aligned path. x3: (N, C, HWp) with HWp % 128 == 0."""
    N, C, HWp = x3.shape
    S = HWp // _LANE
    x4 = x3.reshape(N, C, S, _LANE)

    in_bytes = jnp.dtype(x3.dtype).itemsize
    out_bytes = jnp.dtype(out_dtype).itemsize
    itemsize = max(in_bytes, out_bytes)

    # Nb * s_tile ~= target sublanes: merge several images of the same channel
    # per block when planes are small so the fixed per-step cost is amortized.
    target_sublanes = max(8, target_bytes // (itemsize * _LANE))
    if S >= target_sublanes:
        nb = 1
        s_tile = (target_sublanes // 8) * 8      # keeps (8, 128) tiling
    else:
        s_tile = S                               # full dim -> always legal
        nb = min(N, max(1, target_sublanes // max(S, 1)))

    grid = (pl.cdiv(N, nb), C, pl.cdiv(S, s_tile))
    block = (nb, 1, s_tile, _LANE)
    idx = lambda n, c, s: (n, c, s, 0)

    # 2 streams (x, out) x 2 buffers, plus slack; set explicitly so large
    # tiles never silently drop to single-buffering.
    win_bytes = nb * s_tile * _LANE * (in_bytes + out_bytes)
    vmem_limit = max(16 << 20, int(2 * win_bytes + (4 << 20)))

    cost = pl.CostEstimate(
        flops=2 * N * C * HWp,
        transcendentals=0,
        bytes_accessed=N * C * HWp * (in_bytes + out_bytes),
    )

    out4 = pl.pallas_call(
        _rgb_plane_kernel,
        out_shape=jax.ShapeDtypeStruct((N, C, S, _LANE), out_dtype),
        grid=grid,
        in_specs=[
            pl.BlockSpec(memory_space=pltpu.MemorySpace.SMEM),  # scale (C,)
            pl.BlockSpec(memory_space=pltpu.MemorySpace.SMEM),  # bias  (C,)
            pl.BlockSpec(block, idx),
        ],
        out_specs=pl.BlockSpec(block, idx),
        compiler_params=pltpu.CompilerParams(
            dimension_semantics=("parallel", "parallel", "parallel"),
            vmem_limit_bytes=vmem_limit,
        ),
        cost_estimate=cost,
    )(scale_c, bias_c, x4)
    return out4.reshape(N, C, HWp)


def _normalize_rows(x2, scale_rows, bias_rows, out_dtype, target_bytes):
    """Ragged path. x2: (rows, HW) with HW not a multiple of 128."""
    rows, HW = x2.shape
    in_bytes = jnp.dtype(x2.dtype).itemsize
    out_bytes = jnp.dtype(out_dtype).itemsize
    itemsize = max(in_bytes, out_bytes)

    target_rows = max(1, target_bytes // (itemsize * HW))
    if rows <= 8 or target_rows >= rows:
        row_tile = rows                             # full dim -> always legal
    else:
        row_tile = max(8, (target_rows // 8) * 8)   # (8, 128)-tile friendly

    grid = (pl.cdiv(rows, row_tile),)
    win_bytes = row_tile * HW * (in_bytes + out_bytes)
    vmem_limit = max(16 << 20, int(2 * win_bytes + (4 << 20)))

    cost = pl.CostEstimate(
        flops=2 * rows * HW,
        transcendentals=0,
        bytes_accessed=rows * HW * (in_bytes + out_bytes),
    )

    out2 = pl.pallas_call(
        _rgb_row_kernel,
        out_shape=jax.ShapeDtypeStruct((rows, HW), out_dtype),
        grid=grid,
        in_specs=[
            pl.BlockSpec((row_tile, HW), lambda r: (r, 0)),
            pl.BlockSpec((row_tile, 1), lambda r: (r, 0)),
            pl.BlockSpec((row_tile, 1), lambda r: (r, 0)),
        ],
        out_specs=pl.BlockSpec((row_tile, HW), lambda r: (r, 0)),
        compiler_params=pltpu.CompilerParams(
            dimension_semantics=("parallel",),
            vmem_limit_bytes=vmem_limit,
        ),
        cost_estimate=cost,
    )(x2, scale_rows, bias_rows)
    return out2


def rgb_normalize(x, mean, std, *, out_dtype=None):
    """Pallas TPU implementation of RGB.forward: (x - mean) / std.

    x:    (N, C, H, W), NCHW like the PyTorch module (f32 / bf16 / int ok)
    mean: (1, C, 1, 1)
    std:  (1, C, 1, 1)
    """
    N, C, H, W = x.shape
    HW = H * W
    if out_dtype is None:
        out_dtype = x.dtype if jnp.issubdtype(x.dtype, jnp.floating) else jnp.float32
    out_dtype = jnp.dtype(out_dtype)

    # Fold (x - mean)/std into a single FMA: x * (1/std) + (-mean/std).
    scale_c = (1.0 / std).reshape(C).astype(jnp.float32)
    bias_c = (-mean / std).reshape(C).astype(jnp.float32)

    target_bytes = _target_block_bytes()

    if HW % _LANE == 0:
        out3 = _normalize_planes(x.reshape(N, C, HW), scale_c, bias_c,
                                 out_dtype, target_bytes)
        return out3.reshape(N, C, H, W)

    rows = N * C
    in_bytes = jnp.dtype(x.dtype).itemsize
    out_bytes = out_dtype.itemsize
    if 2 * min(rows, 8) * HW * (in_bytes + out_bytes) > (40 << 20):
        # TODO(synk): pathological, huge non-128-multiple planes; tile the lane
        # axis with masked edge blocks instead of materializing a padded copy.
        hw_pad = pl.cdiv(HW, _LANE) * _LANE
        x2 = jnp.pad(x.reshape(rows, HW), ((0, 0), (0, hw_pad - HW)))
        out3 = _normalize_planes(x2.reshape(N, C, hw_pad), scale_c, bias_c,
                                 out_dtype, target_bytes)
        return out3.reshape(rows, hw_pad)[:, :HW].reshape(N, C, H, W)

    # Ragged spatial size: stream whole contiguous (image, channel) rows with
    # masked lane-tail stores -- no padded input copy, no output slice.
    scale_rows = jnp.broadcast_to(scale_c.reshape(1, C), (N, C)).reshape(rows, 1)
    bias_rows = jnp.broadcast_to(bias_c.reshape(1, C), (N, C)).reshape(rows, 1)
    out2 = _normalize_rows(x.reshape(rows, HW), scale_rows, bias_rows,
                           out_dtype, target_bytes)
    return out2.reshape(N, C, H, W)


if __name__ == "__main__":
    key = jax.random.PRNGKey(0)
    N, C, H, W = 2, 3, 16, 16  # RGB module is hard-coded for 3 channels
    x = jax.random.uniform(key, (N, C, H, W), dtype=jnp.float32)

    # Deterministic "buffers" matching the module's __init__.
    mean = jnp.asarray(IMAGE_RGB_MEAN, dtype=jnp.float32).reshape(1, C, 1, 1)
    std = jnp.asarray(IMAGE_RGB_STD, dtype=jnp.float32).reshape(1, C, 1, 1)

    # Aligned spatial path (HW % 128 == 0).
    out = jax.block_until_ready(rgb_normalize(x, mean, std))
    ref = (x - mean) / std
    assert out.shape == (N, C, H, W)
    assert jnp.allclose(out, ref, atol=1e-6, rtol=1e-6)

    # Ragged spatial path (HW % 128 != 0) -- no pad/slice round-trips.
    x_odd = jax.random.uniform(jax.random.PRNGKey(1), (2, 3, 10, 10), jnp.float32)
    out_odd = jax.block_until_ready(rgb_normalize(x_odd, mean, std))
    ref_odd = (x_odd - mean) / std
    assert jnp.allclose(out_odd, ref_odd, atol=1e-6, rtol=1e-6)

    # bf16 input: halved HBM read traffic, f32 compute inside the kernel.
    x_bf16 = x.astype(jnp.bfloat16)
    out_bf16 = jax.block_until_ready(rgb_normalize(x_bf16, mean, std))
    ref_bf16 = ((x_bf16.astype(jnp.float32) - mean) / std).astype(jnp.bfloat16)
    assert out_bf16.dtype == jnp.bfloat16
    assert jnp.allclose(out_bf16.astype(jnp.float32),
                        ref_bf16.astype(jnp.float32), atol=1e-2, rtol=1e-2)

    print("KERNEL_OK")
</pallas_src>

<mosaic_0001>
module attributes {stable_mosaic.version = 11 : i64} {
  func.func @_rgb_plane_kernel(%arg0: i32, %arg1: i32, %arg2: i32, %arg3: memref<3xf32, #tpu.memory_space<smem>>, %arg4: memref<3xf32, #tpu.memory_space<smem>>, %arg5: memref<2x1x2x128xf32, #tpu.memory_space<vmem>>, %arg6: memref<2x1x2x128xf32, #tpu.memory_space<vmem>>) attributes {dimension_semantics = [#tpu.dimension_semantics<parallel>, #tpu.dimension_semantics<parallel>, #tpu.dimension_semantics<parallel>], iteration_bounds = array<i64: 1, 3, 1>, scalar_prefetch = 0 : i64, scratch_operands = 0 : i64, tpu.core_type = #tpu.core_type<tc>, window_params = [{transform_indices = @transform_0, window_bounds = array<i64: 3>}, {transform_indices = @transform_1, window_bounds = array<i64: 3>}, {transform_indices = @transform_2, window_bounds = array<i64: 2, 1, 2, 128>}, {transform_indices = @transform_3, window_bounds = array<i64: 2, 1, 2, 128>}]} {
    %c0 = arith.constant 0 : index
    %c0_0 = arith.constant 0 : index
    %c0_1 = arith.constant 0 : index
    %c0_2 = arith.constant 0 : index
    %0 = vector.load %arg5[%c0, %c0_0, %c0_1, %c0_2] : memref<2x1x2x128xf32, #tpu.memory_space<vmem>>, vector<2x1x2x128xf32>
    %1 = arith.index_cast %arg1 : i32 to index
    %2 = memref.load %arg3[%1] : memref<3xf32, #tpu.memory_space<smem>>
    %3 = vector.broadcast %2 : f32 to vector<2x1x2x128xf32>
    %4 = arith.mulf %0, %3 : vector<2x1x2x128xf32>
    %5 = arith.index_cast %arg1 : i32 to index
    %6 = memref.load %arg4[%5] : memref<3xf32, #tpu.memory_space<smem>>
    %7 = vector.broadcast %6 : f32 to vector<2x1x2x128xf32>
    %8 = arith.addf %4, %7 : vector<2x1x2x128xf32>
    %c0_3 = arith.constant 0 : index
    %c0_4 = arith.constant 0 : index
    %c0_5 = arith.constant 0 : index
    %c0_6 = arith.constant 0 : index
    %9 = vector.load %arg6[%c0_3, %c0_4, %c0_5, %c0_6] : memref<2x1x2x128xf32, #tpu.memory_space<vmem>>, vector<2x1x2x128xf32>
    tpu.vector_store %arg6[%c0_3, %c0_4, %c0_5, %c0_6], %8 {strides = array<i32>} : memref<2x1x2x128xf32, #tpu.memory_space<vmem>>, vector<2x1x2x128xf32>,
    return
  }
  func.func @transform_0(%arg0: i32, %arg1: i32, %arg2: i32) -> i32 {
    %c0_i32 = arith.constant 0 : i32
    %c0_i32_0 = arith.constant 0 : i32
    return %c0_i32 : i32
  }
  func.func @transform_1(%arg0: i32, %arg1: i32, %arg2: i32) -> i32 {
    %c0_i32 = arith.constant 0 : i32
    %c0_i32_0 = arith.constant 0 : i32
    return %c0_i32 : i32
  }
  func.func @transform_2(%arg0: i32, %arg1: i32, %arg2: i32) -> (i32, i32, i32, i32) {
    %c0_i32 = arith.constant 0 : i32
    %c0_i32_0 = arith.constant 0 : i32
    return %arg0, %arg1, %arg2, %c0_i32 : i32, i32, i32, i32
  }
  func.func @transform_3(%arg0: i32, %arg1: i32, %arg2: i32) -> (i32, i32, i32, i32) {
    %c0_i32 = arith.constant 0 : i32
    %c0_i32_0 = arith.constant 0 : i32
    return %arg0, %arg1, %arg2, %c0_i32 : i32, i32, i32, i32
  }
}

</mosaic_0001>

<bundles_post_ra>
// kernel: tpu_custom_call.1
= control target key start
LH: loop header
LB: loop body
LE: loop exit
PB: predicated region body
PF: predicated region fallthrough
CT: control target
= control target key end

     0   :  { %s837_s0 = inlined_call_operand.hbm [shape: f32[3], index: 0, kind: input, shape index: {}]   ;;  %s838_s1 = inlined_call_operand.hbm [shape: f32[3], index: 1, kind: input, shape index: {}]   ;;  %s839_s2 = inlined_call_operand.hbm [shape: f32[2,3,2,128], index: 2, kind: input, shape index: {}]   ;;  %s840_s3 = inlined_call_operand.hbm [shape: f32[2,3,2,128], index: 3, kind: output, shape index: {}]  }
   0x1   :  { %841 = sst [smem:[#allocation14_spill]] %s837_s0 }
   0x2   :  { %842 = sst [smem:[#allocation15_spill]] %s838_s1 }
   0x3   :  { %8 = vsyncpa [#allocation5], 0 }
   0x4   :  { %9 = vsyncpa [#allocation7], 0 }
   0x5   :  { %10 = vsyncpa [#allocation3], 0 }
   0x6   :  { %12 = vsyncpa [#allocation3 + $0x1], 0 }
   0x7   :  { %13 = vsyncpa [#allocation4], 0 }
   0x8   :  { %15 = vsyncpa [#allocation4 + $0x1], 0  ;;  %s679_s12 = smov 0   ;;  %s681_s13 = smov 0  }
   0x9   :  { %s683_s14 = smov 0   ;;  %s685_s15 = smov 0  }
   0xa   :  { %s687_s16 = smov 0   ;;  %s689_s17 = smov 0  }
   0xb LB: > { %s393_s18 = sadd.s32 4294967295, %s649_s17   ;;  %s394_s19 = sadd.s32 4294967294, %s649_s17   ;;  %s649_s17 = sphi %s689_s17, %s21_s17   ;;  %s645_s16 = sphi %s687_s16, %s856_s16   ;;  %s641_s15 = sphi %s685_s15, %s855_s15   ;;  %s637_s14 = sphi %s683_s14, %s854_s14   ;;  %s633_s13 = sphi %s681_s13, %s853_s13   ;;  %s629_s12 = sphi %s679_s12, %s852_s12  }
   0xc   : > { %s93_s20 = sadd.s32 1, %s637_s14  ;;  %p100_p0 = scmp.ne.s32.totalorder %s637_s14, %s633_s13 }
   0xd   : > { %p101_p1 = scmp.eq.s32.totalorder %s649_s17, 0  ;;  %p106_p2 = scmp.ne.s32.totalorder %s633_s13, %s629_s12 }
   0xe   : > { %p717_p3 = scmp.eq.s32.totalorder %s393_s18, 0  ;;  %p134_p4 = scmp.eq.s32.totalorder %s393_s18, 2 }
   0xf   : > { %p721_p5 = por %p101_p1, %p100_p0  ;;  %p140_p6 = scmp.eq.s32.totalorder %s394_s19, 2 }
  0x10   : > { %p727_p7 = por %p717_p3, %p106_p2  ;;  %p731_p8 = por %p134_p4, %p100_p0 }
  0x11   : > { %p735_p9 = por %p140_p6, %p106_p2  ;;  %p395_p10 = scmp.ge.s32.totalorder %s649_s17, 1 }
  0x12   : > { %p147_p11 = scmp.lt.s32.totalorder %s649_s17, 4  ;;  %s848_s0 = sld [smem:[#allocation14_spill]] }
  0x13   : > { %p439_p13 = scmp.lt.s32.totalorder %s649_s17, 3  ;;  %s850_s1 = sld [smem:[#allocation15_spill]] }
  0x14   : > { %p744_p12 = pnand %p395_p10, %p147_p11  ;;  %s651_s7 = smov [#allocation2]  }
  0x15   : > { %p756_p1 = pnand %p439_p13, %p721_p5  ;;  %s652_s8 = smov [#allocation6]  }
  0x16   : > { %p422_p0 = pneg %p744_p12  ;;  %s36_s9 = sadd.s32 1, %s645_s16 }
  0x17   : > { %s180_s10 = sand.u32 1, %s637_s14   ;;  %p38_p4 = scmp.ge.s32.totalorder %s36_s9, 3 }
  0x18   : > { %s159_s28 = sshll.u32 %s848_s0, 4  ;;  %p423_p2 = pnand %p422_p0, %p717_p3  ;;  %s160_s28 = int_to_ptr.hbm [resolvable:$true] %s159_s28 }
  0x19   : > { %s169_s5 = sshll.u32 %s850_s1, 4  ;;  %s399_s11 = sshll.u32 %s180_s10, 2  ;;  %s170_s5 = int_to_ptr.hbm [resolvable:$true] %s169_s5 }
  0x1a   : > { %425 = dma.hbm_to_smem (!%p423_p2), %s160_s28, 16, %s651_s7, [#allocation5]  }
  0x1b   : > { %428 = dma.hbm_to_smem (!%p423_p2), %s170_s5, 16, %s652_s8, [#allocation7]  }
  0x1c   : > { %s400_s18 = sshll.u32 %s645_s16, 1  ;;  %s858_s9 = smov (%p38_p4, %s36_s9), 0 }
  0x1d   : > { %s192_s26 = scalar_lea.hbm %s839_s2, %s400_s18  ;;  %s87_s27 = ssub.s32 %s645_s16, %s858_s9 }
  0x1e   : > { %s193_s30 = sshll.u32 %s192_s26, 4  ;;  %p91_p5 = scmp.eq.s32.totalorder %s87_s27, 0  ;;  %s194_s30 = int_to_ptr.hbm [resolvable:$true] %s193_s30 }
  0x1f   : > { %s184_s28 = scalar_lea.vmem [#allocation8], %s399_s11  ;;  %s181_s7 = scalar_lea.sflag [#allocation3], %s180_s10 }
  0x20   : > { %s195_s4 = sshll.u32 %s184_s28, 4  ;;  %s653_s8 = smov 96   ;;  %s196_s4 = int_to_ptr.vmem [resolvable:$true] %s195_s4 }
  0x21   : > { %s775_s5 = scalar_select %p91_p5, %s637_s14, %s93_s20  }
  0x22   : > { %s654_s0 = smov 32   ;;  %s655_s1 = smov 2  }
  0x23   : > { %432 = dma.hbm_to_vmem [thread:$0]  (!%p756_p1), %s194_s30, 64, %s196_s4, %s181_s7, %s653_s8, %s654_s0, %s655_s1  }
  0x24   : > { %207 = sbr.rel (%p744_p12) target bundleno = 68 (0x44), region = 32 }
  0x29   : > { %612 = dma.done.wait (%p717_p3), [#allocation5], 16  }
  0x2a   : > { %614 = vsyncadd (%p717_p3), [#allocation5], 4294967280 }
  0x2b   : > { %616 = dma.done.wait (%p717_p3), [#allocation7], 16  }
  0x2c   : > { %618 = vsyncadd (%p717_p3), [#allocation7], 4294967280  ;;  %s790_s20 = sand.u32 1, %s633_s13  }
  0x2d   : > { %s404_s0 = sshll.u32 %s790_s20, 2  ;;  %s220_s1 = scalar_lea.sflag [#allocation3], %s790_s20 }
  0x2e   : > { %s223_s29 = scalar_lea.vmem [#allocation8], %s404_s0 }
  0x2f   : > { %620 = dma.done.wait (%p727_p7), %s220_s1, 64  }
  0x30   : > { %622 = vsyncadd (%p727_p7), %s220_s1, 4294967232 }
  0x31   : > { %229 = sfence }
  0x32   : > { %s252_s21 = sld [smem:[#allocation2 + %s641_s15]]  ;;  %s407_s10 = sshll.u32 %s641_s15, 1  ;;  %v250_v0 = vld [vmem:[%s223_s29] sm:$0x3]  ;;  %v251_v1 = vld [vmem:[%s223_s29 + $0x2] sm:$0x3] }
  0x33   : > { %s256_s6 = sld [smem:[#allocation6 + %s641_s15]]  ;;  %s277_s19 = scalar_lea.hbm %s840_s3, %s407_s10 }
  0x34   : > { %s247_s22 = scalar_lea.vmem [#allocation9], %s404_s0  ;;  %s280_s23 = sshll.u32 %s277_s19, 4  ;;  %s281_s23 = int_to_ptr.hbm [resolvable:$true] %s280_s23 }
  0x35   : > { %s278_s26 = sshll.u32 %s247_s22, 4  ;;  %s263_s15 = scalar_lea.sflag [#allocation4], %s790_s20  ;;  %s279_s26 = int_to_ptr.vmem [resolvable:$true] %s278_s26 }
  0x36   : > { %s573_s27 = sshra.s32 %s281_s23, 4  ;;  %s579_s7 = scalar_lea.hbm %s840_s3, 12  ;;  %s574_s27 = int_to_ptr.hbm [resolvable:$true] %s573_s27 }
  0x37   : > { %s575_s30 = scalar_lea.hbm %s574_s27, 4  ;;  %p580_p10 = scmp.lt.s32.totalorder %s574_s27, %s840_s3 }
  0x38   : > { %v253_v2 = vstv %s252_s21  ;;  %p576_p3 = scmp.ne.s32.totalorder %s574_s27, %s575_s30  ;;  %p581_p11 = scmp.lt.s32.totalorder %s579_s7, %s575_s30 }
  0x39   : > { %v254_v3 = vmul.f32 %v253_v2, %v250_v0  ;;  %v257_v4 = vstv %s256_s6  ;;  %v255_v5 = vmul.f32 %v253_v2, %v251_v1 }
  0x3a   : > { %p577_p6 = pnand %p576_p3, %p731_p8  ;;  %p582_p12 = por %p581_p11, %p580_p10 }
  0x3b   : > { %v258_v6 = vadd.f32 %v257_v4, %v254_v3  ;;  %v259_v7 = vadd.f32 %v257_v4, %v255_v5 }
  0x3c   : > { %p578_p7 = pneg %p577_p6 }
  0x3d   : > { %260 = vst [vmem:[%s247_s22] sm:$0x3] %v258_v6 }
  0x3e   : > { %261 = vst [vmem:[%s247_s22 + $0x2] sm:$0x3] %v259_v7  ;;  %p583_p13 = pnand %p582_p12, %p578_p7 }
  0x40   : > { %586 = shalt.err (!%p583_p13)
}
  0x41   : > { %s656_s20 = smov 32   ;;  %s657_s1 = smov 96  }
  0x42   : > { %s658_s29 = smov 2  }
  0x43   : > { %420 = dma.vmem_to_hbm [thread:$0]  (%p731_p8), %s279_s26, 64, %s281_s23, %s263_s15, %s656_s20, %s657_s1, %s658_s29  }
  0x44 PF: > { %p442_p0 = scmp.ge.s32.totalorder %s649_s17, 2  ;;  %s295_s21 = sand.u32 1, %s629_s12  }
  0x45   : > { %s296_s6 = scalar_lea.sflag [#allocation4], %s295_s21 }
  0x46   : > { %p434_p1 = pnand %p442_p0, %p735_p9 }
  0x48   : > { %p435_p2 = pneg %p434_p1 }
  0x4a   : > { %624 = dma.done.wait (%p435_p2), %s296_s6, 64  }
  0x4b   : > { %626 = vsyncadd (%p435_p2), %s296_s6, 4294967232  ;;  %s21_s17 = sadd.s32 1, %s649_s17   ;;  %s852_s12 = smov %s633_s13 }
  0x4c   : > { %p18_p4 = scmp.ge.s32.totalorder %s21_s17, 5   ;;  %s853_s13 = smov %s637_s14 }
  0x4d   : > { %s854_s14 = smov %s775_s5  ;;  %s855_s15 = smov %s645_s16 }
  0x4e   : > { %s856_s16 = smov %s858_s9  ;;  %20 = sbr.rel (!%p18_p4) target bundleno = 11 (0xb), region = 86 }
  0x53   :  { %302 = vsyncpa [#allocation3], 1 }
  0x54   :  { %304 = vsyncpa [#allocation3 + $0x1], 1 }
  0x55   :  { %305 = vsyncpa [#allocation4], 1 }
  0x56   :  { %307 = vsyncpa [#allocation4 + $0x1], 1 }
  0x57   :  { %308 = vsyncpa [#allocation5], 1 }
  0x58   :  { %310 = vsyncpa [#allocation5 + $0x1], 1 }
  0x59   :  { %311 = vsyncpa [#allocation7], 1 }

</bundles_post_ra>
